<compile_context>
chip_gen: v7x
topology: tpu7x:2x2x1
jax: 0.10.0
libtpu: 0.0.40
codegen_flags: <defaults>
</compile_context>

<pallas_src>
import jax
import jax.numpy as jnp
from jax.experimental import pallas as pl
from jax.experimental.pallas import tpu as pltpu

# Constructor argument `basis` of the PyTorch module (chosen deterministically
# in-script; each f preserves the last-dim size so expand_C = len(BASIS)*C).
BASIS = (lambda x: x, lambda x: x * x)


def _fused_kernel(x_ref, w_ref, b_ref, o_ref):
    # x_ref: (tn, K*C)  w_ref: (nb*K*C, K*O)  b_ref: (1, K*O)  o_ref: (tn, K*O)
    x = x_ref[...]
    # Lane concat of all basis expansions (XLU slot; VALU/MXU untouched).
    xe = jnp.concatenate([f(x) for f in BASIS], axis=-1)        # (tn, nb*K*C)
    # Single MXU pass over the fused block-diagonal weight, f32 accumulation.
    acc = jnp.dot(xe, w_ref[...], preferred_element_type=jnp.float32)
    o_ref[...] = (acc + b_ref[...]).astype(o_ref.dtype)


def _round_up(v, m):
    return ((v + m - 1) // m) * m


def net_forward(x, neuron, W, b, C, *, row_tile=8192, compute_dtype=jnp.float32):
    """
    x      : (N, K*C) float32, K = len(neuron)
    neuron : (K,) int32 indices into `channels`
    W      : (channels, O, E) float32 with E = len(BASIS)*C  (Parallel_MLP weights)
    b      : (channels, O)    float32
    compute_dtype : jnp.float32 (default) or jnp.bfloat16 (v5e: bf16-native MXU,
                    halves input HBM bytes; accumulation stays f32).
    returns: (N, K*O) float32   (== PyTorch out.view(out.shape[0], -1))
    """
    N, KC = x.shape
    K = int(neuron.shape[0])
    O = W.shape[1]
    E = W.shape[2]
    nb = len(BASIS)
    assert KC == K * C and E == nb * C

    # Host-side glue on tiny tensors only: gather per-neuron params and build a
    # single block-diagonal (nb*K*C, K*O) weight so every channel AND every
    # basis function fuses into one lane-dense matmul (no activation transpose,
    # no per-basis partial sums in the kernel).
    Wn = W[neuron]                                              # (K, O, E)
    eyeK = jnp.eye(K, dtype=W.dtype)                            # (K, K)
    w_blocks = []
    for j in range(nb):
        Wj = jnp.transpose(Wn[:, :, j * C:(j + 1) * C], (0, 2, 1))   # (K, C, O)
        w_blocks.append(jnp.einsum("kco,kl->kclo", Wj, eyeK).reshape(K * C, K * O))
    w_cat = jnp.concatenate(w_blocks, axis=0).astype(compute_dtype)  # (nb*K*C, K*O)
    bias = b[neuron].reshape(1, K * O).astype(jnp.float32)           # (1, K*O)
    xk = x.astype(compute_dtype)

    # Row tile: as large as VMEM comfortably allows (amortizes the ~0.35 us
    # per-step pipeline overhead), but capped at ceil(N/2) so the single
    # "parallel" grid axis always has >= 2 iterations for v7x megacore.
    # No padding of x and no output slice: grid = cdiv(N, tn); Pallas clips the
    # out-of-bounds writeback of the partial last block (op is row-wise).
    tn = min(_round_up(row_tile, 8), _round_up(pl.cdiv(N, 2), 8))
    grid = (pl.cdiv(N, tn),)

    # VMEM (lane-padded, double-buffered): in ~tn*128*4*2, out ~tn*128*4*2,
    # plus the (tn, nb*K*C) concat intermediate -> ~22 MB at tn=8192. Fits the
    # 32 MiB scoped limit on every generation (v7x physical VMEM is 64 MiB).
    out = pl.pallas_call(
        _fused_kernel,
        out_shape=jax.ShapeDtypeStruct((N, K * O), jnp.float32),
        grid_spec=pltpu.PrefetchScalarGridSpec(
            num_scalar_prefetch=0,
            grid=grid,
            in_specs=[
                pl.BlockSpec((tn, K * C), lambda i: (i, 0)),
                pl.BlockSpec((nb * K * C, K * O), lambda i: (0, 0)),
                pl.BlockSpec((1, K * O), lambda i: (0, 0)),
            ],
            out_specs=pl.BlockSpec((tn, K * O), lambda i: (i, 0)),
        ),
        compiler_params=pltpu.CompilerParams(
            dimension_semantics=("parallel",),      # shards N tiles across v7x's 2 TCs
            vmem_limit_bytes=32 * 1024 * 1024,
        ),
    )(xk, w_cat, bias)

    return out


def _reference(x, neuron, W, b, C):
    N = x.shape[0]
    K = neuron.shape[0]
    xi = x.reshape(N, K, C)
    xe = jnp.concatenate([f(xi) for f in BASIS], axis=-1)          # (N, K, E)
    Wn = W[neuron]                                                 # (K, O, E)
    bn = b[neuron]                                                 # (K, O)
    out = jnp.einsum("nke,koe->nko", xe, Wn) + bn[None, :, :]      # (N, K, O)
    return out.reshape(N, -1)


if __name__ == "__main__":
    # Small shapes consistent with the module.
    C = 4            # in_dims per channel
    channels = 6     # total neurons in the Parallel_MLP
    max_count = 10   # output dim per neuron = max_count + 1 = 11
    O = max_count + 1
    E = len(BASIS) * C

    key = jax.random.PRNGKey(0)
    kx, kw, kb = jax.random.split(key, 3)
    neuron = jnp.arange(channels, dtype=jnp.int32)                  # evaluate all neurons
    K = int(neuron.shape[0])

    N = 40   # samples * time; deliberately not a multiple of the test tile
    x = jax.random.normal(kx, (N, K * C), dtype=jnp.float32)
    W = jax.random.normal(kw, (channels, O, E), dtype=jnp.float32) * 0.1
    b = jax.random.normal(kb, (channels, O), dtype=jnp.float32) * 0.1

    ref = _reference(x, neuron, W, b, C)

    # Exercise the multi-tile + clipped partial-last-block path explicitly.
    out = jax.block_until_ready(net_forward(x, neuron, W, b, C, row_tile=16))
    assert out.shape == (N, K * O)
    assert jnp.allclose(out, ref, atol=1e-5, rtol=1e-5)

    # Production tile size (capped to ceil(N/2) here -> 2 grid steps).
    out2 = jax.block_until_ready(net_forward(x, neuron, W, b, C))
    assert out2.shape == (N, K * O)
    assert jnp.allclose(out2, ref, atol=1e-5, rtol=1e-5)

    print("KERNEL_OK")
</pallas_src>

<mosaic_0001>
module attributes {stable_mosaic.version = 11 : i64} {
  func.func @_fused_kernel(%arg0: i32, %arg1: memref<16x24xf32, #tpu.memory_space<vmem>>, %arg2: memref<48x66xf32, #tpu.memory_space<vmem>>, %arg3: memref<1x66xf32, #tpu.memory_space<vmem>>, %arg4: memref<16x66xf32, #tpu.memory_space<vmem>>) attributes {dimension_semantics = [#tpu.dimension_semantics<parallel>], iteration_bounds = array<i64: 3>, scalar_prefetch = 0 : i64, scratch_operands = 0 : i64, tpu.core_type = #tpu.core_type<tc>, window_params = [{transform_indices = @transform_0, window_bounds = array<i64: 16, 24>}, {pipeline_mode = #tpu.pipeline_mode<synchronous>, transform_indices = @transform_1, window_bounds = array<i64: 48, 66>}, {pipeline_mode = #tpu.pipeline_mode<synchronous>, transform_indices = @transform_2, window_bounds = array<i64: 1, 66>}, {transform_indices = @transform_3, window_bounds = array<i64: 16, 66>}]} {
    %c0 = arith.constant 0 : index
    %c0_0 = arith.constant 0 : index
    %0 = vector.load %arg1[%c0, %c0_0] : memref<16x24xf32, #tpu.memory_space<vmem>>, vector<16x24xf32>
    %1 = arith.mulf %0, %0 : vector<16x24xf32>
    %2 = tpu.concatenate %0, %1 in 1 : vector<16x24xf32>, vector<16x24xf32> -> vector<16x48xf32>
    %c0_1 = arith.constant 0 : index
    %c0_2 = arith.constant 0 : index
    %3 = vector.load %arg2[%c0_1, %c0_2] : memref<48x66xf32, #tpu.memory_space<vmem>>, vector<48x66xf32>
    %cst = arith.constant dense<0.000000e+00> : vector<16x66xf32>
    %4 = tpu.matmul %2, %3, %cst {dimension_numbers = #tpu.dot_dimension_numbers<[1], [0], [0], [1], [0, 0, 1, 1], [], []>} : vector<16x48xf32>, vector<48x66xf32>, vector<16x66xf32> -> vector<16x66xf32>
    %c0_3 = arith.constant 0 : index
    %c0_4 = arith.constant 0 : index
    %5 = vector.load %arg3[%c0_3, %c0_4] : memref<1x66xf32, #tpu.memory_space<vmem>>, vector<1x66xf32>
    %6 = vector.broadcast %5 : vector<1x66xf32> to vector<16x66xf32>
    %7 = arith.addf %4, %6 : vector<16x66xf32>
    %c0_5 = arith.constant 0 : index
    %c0_6 = arith.constant 0 : index
    %8 = vector.load %arg4[%c0_5, %c0_6] : memref<16x66xf32, #tpu.memory_space<vmem>>, vector<16x66xf32>
    tpu.vector_store %arg4[%c0_5, %c0_6], %7 {strides = array<i32>} : memref<16x66xf32, #tpu.memory_space<vmem>>, vector<16x66xf32>,
    return
  }
  func.func @transform_0(%arg0: i32) -> (i32, i32) {
    %c0_i32 = arith.constant 0 : i32
    %c0_i32_0 = arith.constant 0 : i32
    return %arg0, %c0_i32 : i32, i32
  }
  func.func @transform_1(%arg0: i32) -> (i32, i32) {
    %c0_i32 = arith.constant 0 : i32
    %c0_i32_0 = arith.constant 0 : i32
    %c0_i32_1 = arith.constant 0 : i32
    return %c0_i32, %c0_i32_0 : i32, i32
  }
  func.func @transform_2(%arg0: i32) -> (i32, i32) {
    %c0_i32 = arith.constant 0 : i32
    %c0_i32_0 = arith.constant 0 : i32
    %c0_i32_1 = arith.constant 0 : i32
    return %c0_i32, %c0_i32_0 : i32, i32
  }
  func.func @transform_3(%arg0: i32) -> (i32, i32) {
    %c0_i32 = arith.constant 0 : i32
    %c0_i32_0 = arith.constant 0 : i32
    return %arg0, %c0_i32 : i32, i32
  }
}

</mosaic_0001>

<bundles_post_ra>
// kernel: tpu_custom_call.1
= control target key start
LH: loop header
LB: loop body
LE: loop exit
PB: predicated region body
PF: predicated region fallthrough
CT: control target
= control target key end

     0   :  { %8 = vsyncpa [#allocation3], 0  ;;  %s713_s0 = inlined_call_operand.vmem [shape: f32[40,24], index: 0, kind: input, shape index: {}]   ;;  %s714_s1 = inlined_call_operand.vmem [shape: f32[48,66], index: 1, kind: input, shape index: {}]   ;;  %s715_s2 = inlined_call_operand.vmem [shape: f32[1,66], index: 2, kind: input, shape index: {}]   ;;  %s716_s3 = inlined_call_operand.hbm [shape: f32[40,66], index: 3, kind: output, shape index: {}]  }
   0x1   :  { %10 = vsyncpa [#allocation3 + $0x1], 0  ;;  %s575_s12 = smov 0   ;;  %s577_s13 = smov 0  }
   0x2   :  { %s579_s14 = smov 0   ;;  %s581_s15 = smov 0  }
   0x3 LB: > { %s596_s16 = sadd.s32 4294967295, %s549_s15   ;;  %s391_s17 = sadd.s32 4294967294, %s549_s15   ;;  %s549_s15 = sphi %s581_s15, %s722_s15   ;;  %s545_s14 = sphi %s579_s14, %s721_s14   ;;  %s541_s13 = sphi %s577_s13, %s720_s13   ;;  %s537_s12 = sphi %s575_s12, %s719_s12  }
   0x4   : > { %s600_s18 = sadd.s32 1, %s549_s15   ;;  %s91_s19 = sadd.s32 1, %s545_s14 }
   0x5   : > { %s88_s20 = ssub.s32 %s549_s15, %s600_s18  ;;  %p101_p0 = scmp.ne.s32.totalorder %s545_s14, %s541_s13 }
   0x6   : > { %p89_p1 = scmp.eq.s32.totalorder %s88_s20, 0  ;;  %p102_p2 = scmp.eq.s32.totalorder %s596_s16, 2 }
   0x7   : > { %p107_p3 = scmp.ne.s32.totalorder %s541_s13, %s537_s12  ;;  %p108_p4 = scmp.eq.s32.totalorder %s391_s17, 2 }
   0x8   : > { %s611_s21 = scalar_select %p89_p1, %s545_s14, %s91_s19  }
   0x9   : > { %p613_p5 = por %p102_p2, %p101_p0  ;;  %p617_p6 = por %p108_p4, %p107_p3 }
   0xa   : > { %p394_p7 = scmp.ge.s32.totalorder %s549_s15, 1  ;;  %p149_p8 = scmp.lt.s32.totalorder %s549_s15, 4 }
   0xc   : > { %p150_p9 = pnand %p394_p7, %p149_p8 }
   0xd   : > { %s624_s24 = sshll.u32 (!%p150_p9), %s596_s16, 1  ;;  %v211_v0 = vld [vmem:[%s714_s1] sm:$0xff] (!%p150_p9)  ;;  %v212_v1 = vld [vmem:[%s714_s1 + $0x8] sm:$0xff] (!%p150_p9)  ;;  %v213_v2 = vld [vmem:[%s714_s1 + $0x10] sm:$0xff] (!%p150_p9)  ;;  %s551_s25 = smov (!%p150_p9), 24   ;;  %vm208_vm0 = vcmask (!%p150_p9), 195584  }
   0xe   : > { %153 = sbr.rel (%p150_p9) target bundleno = 392 (0x188), region = 32  ;;  %p182_p10 = scmp.lt.s32.totalorder (!%p150_p9), %s624_s24, 4  ;;  %v434_v3 = vpack.c.bf16 (!%p150_p9), %v212_v1, %v211_v0  ;;  %v214_v4 = vld [vmem:[%s714_s1 + $0x18] sm:$0xff] (!%p150_p9)  ;;  %v215_v6 = vld [vmem:[%s714_s1 + $0x20] sm:$0xff] (!%p150_p9)  ;;  %v216_v7 = vld [vmem:[%s714_s1 + $0x28] sm:$0xff] (!%p150_p9)  ;;  %vm224_vm1 = vcmask (!%p150_p9), 392192  }
   0xf   : > { %v438_v5 = vpack.c.bf16 (!%p150_p9), %v214_v4, %v213_v2  ;;  %v442_v8 = vpack.c.bf16 (!%p150_p9), %v216_v7, %v215_v6  ;;  %s174_s26 = sand.u32 (!%p150_p9), 1, %s541_s13   ;;  %v398_v17 = vld [vmem:[%s715_s2] ss:$0 sm:$0xff] (!%p150_p9)  ;;  %vm306_vm2 = vcmask (!%p150_p9), 539648  }
  0x10   : > { %435 = vmatprep.subr.bf16.mxu0 (!%p150_p9), %v434_v3  ;;  %s395_s27 = sshll.u32 (!%p150_p9), %s174_s26, 4  ;;  %s653_s4 = scalar_lea.sflag (!%p150_p9), [#allocation3], %s174_s26 }
  0x11   : > { %437 = vmatpush3.bf16.msra.mxu0 (!%p150_p9), %v434_v3  ;;  %s176_s30 = scalar_lea.vmem (!%p150_p9), [#allocation2], %s395_s27 }
  0x12   : > { %439 = vmatprep.subr.bf16.mxu0 (!%p150_p9), %v438_v5 }
  0x15   : > { %s183_s10 = scalar_select %p182_p10, %s624_s24, 4  ;;  %441 = vmatpush3.bf16.msra.mxu0 %v438_v5 }
  0x16   : > { %443 = vmatprep.subr.bf16.mxu0 %v442_v8  ;;  %s318_s5 = ssub.s32 (%p613_p5), 5, %s624_s24 }
  0x17   : > { %s397_s11 = sshll.u32 %s183_s10, 3  ;;  %p319_p11 = scmp.lt.s32.totalorder (%p613_p5), %s318_s5, 2 }
  0x18   : > { %s185_s20 = scalar_lea.vmem %s713_s0, %s397_s11 }
  0x19   : > { %v196_v9 = vld [vmem:[%s185_s20] sm:$0xff]  ;;  %v197_v10 = vld [vmem:[%s185_s20 + $0x8] sm:$0xff]  ;;  %445 = vmatpush3.bf16.msra.mxu0 %v442_v8 }
  0x1a   : > { %v198_v11 = vmul.f32 %v196_v9, %v196_v9  ;;  %v199_v12 = vmul.f32 %v197_v10, %v197_v10 }
  0x1c   : > { %202 = vrot.lane.b32.xlu0 %v198_v11, %s551_s25 }
  0x20   : > { %204 = vrot.lane.b32.xlu0 %v199_v12, %s551_s25 }
  0x8e   : > { %v203_v13 = vpop.permute.xlu0 %202 }
  0x8f   : > { %v209_v14 = vsel %vm208_vm0, %v196_v9, %v203_v13 }
  0x90   : > { %431 = vmatprep.mubr.msk.f32.mxu0 %vm224_vm1, %v209_v14 }
  0x92   : > { %v205_v15 = vpop.permute.xlu0 %204 }
  0x93   : > { %v210_v16 = vsel %vm208_vm0, %v197_v10, %v205_v15 }
  0x94   : > { %432 = vmatmul.mubr.msk.f32.vlgmr.msra.gmra.mrb[0].mxu0 %vm224_vm1, %v210_v16 }
 0x165   : > { %316 = sbr.rel (!%p613_p5) target bundleno = 392 (0x188), region = 36 }
 0x167   : > { %v433_v18 = vpop.f32.mrb[0].mxu0 }
 0x168   : > { %v303_v19 = vadd.f32 %v433_v18, %v398_v17  ;;  %v297_v20 = vpop.f32.mrb[1].mxu0 }
 0x169   : > { %v298_v21 = vadd.f32 %v398_v17, %v297_v20 }
 0x16a   : > { %308 = vst.msk [vmem:[%s176_s30 + $0x8] sm:$0xff] %vm306_vm2, %v303_v19 }
 0x16b   : > { %307 = vst.msk [vmem:[%s176_s30] sm:$0xff] %vm306_vm2, %v298_v21 }
 0x16c   : > { %s724_s5 = smov (!%p319_p11, %s318_s5), 2 }
 0x16d   : > { %s658_s6 = sshll.u32 %s724_s5, 7 }
 0x16e   : > { %s323_s7 = ssub.s32 256, %s658_s6 }
 0x16f   : > { %324 = vsyncadd %s653_s4, %s323_s7  ;;  %p404_p12 = scmp.ne.s32.totalorder %s658_s6, 0  ;;  %s410_s8 = sshll.u32 %s596_s16, 8 }
 0x170   : > { %s667_s22 = scalar_lea.hbm %s716_s3, %s410_s8  ;;  %s329_s11 = sshll.u32 %s176_s30, 4  ;;  %s669_s11 = int_to_ptr.vmem [resolvable:$true] %s329_s11 }
 0x171   : > { %s487_s24 = scalar_lea.vmem %s669_s11, %s658_s6  ;;  %s552_s17 = smov [#allocation2]  }
 0x172   : > { %p488_p13 = scmp.ne.s32.totalorder %s669_s11, %s487_s24  ;;  %s491_s19 = sshll.u32 %s552_s17, 4  ;;  %s492_s19 = int_to_ptr.vmem [resolvable:$false] %s491_s19 }
 0x173   : > { %s493_s16 = scalar_lea.vmem %s492_s19, 512  ;;  %p494_p2 = scmp.lt.s32.totalorder %s669_s11, %s492_s19 }
 0x174   : > { %p489_p0 = pnand %p488_p13, %p404_p12  ;;  %p495_p3 = scmp.lt.s32.totalorder %s493_s16, %s487_s24 }
 0x176   : > { %p490_p1 = pneg %p489_p0  ;;  %p496_p4 = por %p495_p3, %p494_p2 }
 0x178   : > { %p497_p5 = pnand %p496_p4, %p490_p1 }
 0x17a   : > { %500 = shalt.err (!%p497_p5)
}
 0x17b   : > { %s501_s20 = scalar_lea.hbm %s667_s22, %s658_s6  ;;  %s505_s27 = scalar_lea.hbm %s716_s3, 640 }
 0x17c   : > { %p502_p7 = scmp.ne.s32.totalorder %s667_s22, %s501_s20  ;;  %p506_p10 = scmp.lt.u32.totalorder %s667_s22, %s716_s3 }
 0x17d   : > { %p507_p11 = scmp.lt.u32.totalorder %s505_s27, %s501_s20  ;;  %p509_p0 = scmp.lt.u32.totalorder %s501_s20, %s667_s22 }
 0x17e   : > { %p503_p8 = pnand %p502_p7, %p404_p12 }
 0x17f   : > { %p508_p13 = por %p507_p11, %p506_p10 }
 0x180   : > { %p504_p9 = pneg %p503_p8 }
 0x181   : > { %p510_p1 = por %p509_p0, %p508_p13 }
 0x183   : > { %p511_p2 = pnand %p510_p1, %p504_p9 }
 0x185   : > { %514 = shalt.err (!%p511_p2)
}
 0x186   : > { %s553_s30 = smov 128   ;;  %s554_s5 = smov 8  }
 0x187   : > { %335 = dma.vmem_to_hbm [thread:$0]  (%p404_p12), %s669_s11, %s658_s6, %s667_s22, %s653_s4, %s553_s30, %s553_s30, %s554_s5  }
 0x188 PF: > { %p451_p3 = scmp.ge.s32.totalorder %s549_s15, 2  ;;  %s344_s7 = sand.u32 1, %s537_s12  }
 0x189   : > { %s345_s8 = scalar_lea.sflag [#allocation3], %s344_s7 }
 0x18a   : > { %p448_p4 = pnand %p451_p3, %p617_p6 }
 0x18c   : > { %532 = dma.done.wait (!%p448_p4), %s345_s8, 256  }
 0x18d   : > { %534 = vsyncadd (!%p448_p4), %s345_s8, 4294967040  ;;  %p13_p5 = scmp.ge.s32.totalorder %s600_s18, 5   ;;  %s719_s12 = smov %s541_s13 }
 0x18e   : > { %s720_s13 = smov %s545_s14  ;;  %s721_s14 = smov %s611_s21 }
 0x18f   : > { %s722_s15 = smov %s600_s18  ;;  %15 = sbr.rel (!%p13_p5) target bundleno = 3 (0x3), region = 67 }
 0x196   :  { %350 = vsyncpa [#allocation3], 1 }
 0x197   :  { %352 = vsyncpa [#allocation3 + $0x1], 1 }

</bundles_post_ra>
